<compile_context>
chip_gen: v6e
topology: v6e:2x2x1
jax: 0.10.0
libtpu: 0.0.40
codegen_flags: <defaults>
</compile_context>

<pallas_src>
import functools

import jax
import jax.numpy as jnp
from jax.experimental import pallas as pl
from jax.experimental.pallas import tpu as pltpu


# Tiny working set; 32 MiB is <= the default scoped limit on v6e/v7x and well
# inside v7x's 64 MiB physical VMEM, while lifting v5e's 16 MiB default.
_VMEM_LIMIT = 32 * 1024 * 1024


def _round_up(x, m):
    return ((x + m - 1) // m) * m


# ----------------------------------------------------------------------------
# Fused Pallas kernel: conv(3x3, s2, p1) + ReLU + adaptive-pool + head
# ----------------------------------------------------------------------------

def _fused_encoder_kernel(xm_ref, xe_ref, wc_ref, bc_ref, pm_ref, wf_ref,
                          bf_ref, pooled_ref, attrs_ref, gacc_ref,
                          *, kh, wo, inv_count):
    """One pooled output row of one batch element per grid step.

    Grid = (B, S).  Step (b, oy) streams only the (2*kh+1)-row slab of the
    paired-column input that feeds pooled row oy, computes the kh conv rows
    entirely in VMEM (fused bias + ReLU), emits the (1, 1, S, Cpad) pooled
    row via a single pooling-matrix dot, and accumulates the running
    global-average-pool sum in `gacc_ref`.  The last pooled row of each batch
    element finishes the (1, C) @ (C, A) classifier head.

    Invariant (correctness): the oy axis must remain the innermost,
    sequentially executed ("arbitrary") grid axis so the scratch accumulator
    is zeroed at oy == 0 and consumed at oy == S-1 for every batch element.
    """
    oy = pl.program_id(1)
    cpad = pooled_ref.shape[-1]
    s = pooled_ref.shape[2]

    @pl.when(oy == 0)
    def _():
        gacc_ref[...] = jnp.zeros_like(gacc_ref)

    xm = xm_ref[...]                       # (1, 2*kh, Wq, 2*Cin)  bf16
    xe = xe_ref[...]                       # (1, 1,    Wq, 2*Cin)  bf16
    bias = bc_ref[...]                     # (1, Cpad)             f32

    # Sum of the kh conv-output rows feeding this pooled row, full W res.
    row_acc = jnp.zeros((wo, cpad), jnp.float32)
    for y_local in range(kh):
        acc = jnp.zeros((wo, cpad), jnp.float32)
        for dy in range(3):
            r = 2 * y_local + dy           # local padded-input row
            src = xm[0, r] if r < 2 * kh else xe[0, 0]   # (Wq, 2*Cin) bf16
            for o in range(2):             # paired-column tap (dx folded)
                acc += jnp.dot(src[o:o + wo, :], wc_ref[dy, o],
                               preferred_element_type=jnp.float32)
        row_acc += jnp.maximum(acc + bias, 0.0)          # fused bias + ReLU

    # Pooled row: one (S, Wo) @ (Wo, Cpad) dot (pool means baked into pm),
    # one lane-dense store.
    pooled = jnp.dot(pm_ref[...], row_acc, preferred_element_type=jnp.float32)
    pooled_ref[...] = pooled.reshape(1, 1, s, cpad)

    # Running global-average-pool sum (raw post-ReLU conv outputs).
    gacc_ref[...] += jnp.sum(row_acc, axis=0, keepdims=True)

    # Classifier head on the last pooled row of this batch element.
    @pl.when(oy == pl.num_programs(1) - 1)
    def _():
        g = gacc_ref[...] * inv_count                    # (1, Cpad) global mean
        attrs = jnp.dot(g, wf_ref[...], preferred_element_type=jnp.float32)
        attrs_ref[...] = (attrs + bf_ref[...]).reshape(1, 1, -1)


# ----------------------------------------------------------------------------
# JAX wrapper (layout, padding, weight packing)
# ----------------------------------------------------------------------------

@functools.partial(jax.jit, static_argnames=("enc_image_size",))
def encoder_forward(images_nchw, params, enc_image_size):
    """Returns (encoder_features (B, S, S, C_enc), encoder_attrs (B, A))."""
    conv_w, conv_b, fc_w, fc_b = params
    c_enc, c_in = conv_w.shape[0], conv_w.shape[1]
    n_attrs = fc_w.shape[0]

    # NCHW (PyTorch) -> NHWC; the reference's .permute(0, 2, 3, 1) is then a
    # no-op because the kernel is NHWC throughout.
    x = jnp.transpose(images_nchw, (0, 2, 3, 1)).astype(jnp.float32)
    b, h, w, _ = x.shape
    ho = (h - 1) // 2 + 1                  # conv output spatial dims (s2, p1)
    wo = (w - 1) // 2 + 1

    s = enc_image_size
    assert ho % s == 0 and wo % s == 0, (
        "uniform-window AdaptiveAvgPool requires Hf % S == 0 and Wf % S == 0")
    # TODO(synk): PyTorch AdaptiveAvgPool2d also handles non-divisible feature
    # maps with variable-size windows; only the uniform-window case is here.
    kh, kw = ho // s, wo // s

    c_pad = _round_up(c_enc, 128)          # lane-dense conv output channels
    a_pad = _round_up(n_attrs, 128)        # lane-dense attrs output
    c2 = 2 * c_in

    # Zero-pad spatially (conv pad = 1) and make the padded width even so
    # adjacent column pairs fold into channels with a pure reshape
    # (space-to-depth along W).  No im2col, no strided kernel accesses.
    hp = h + 2
    wp = 2 * wo + 2
    xp = jnp.pad(x, ((0, 0), (1, 1), (1, wp - w - 1), (0, 0)))
    wq = wp // 2
    xs = xp.reshape(b, hp, wq, c2).astype(jnp.bfloat16)

    # Conv weights: PyTorch (Cout, Cin, 3, 3) -> per-(dy, column-phase)
    # matrices (3, 2, 2*Cin, Cpad) matching the paired-column input layout:
    #   phase 0 : taps dx=0 (even col) and dx=1 (odd col)
    #   phase 1 : tap  dx=2 (next even col), upper half zero.
    wt = jnp.transpose(conv_w, (2, 3, 1, 0))                        # (3,3,Cin,Cout)
    wt = jnp.pad(wt, ((0, 0), (0, 0), (0, 0), (0, c_pad - c_enc)))
    w_o0 = jnp.concatenate([wt[:, 0], wt[:, 1]], axis=1)            # (3,2Cin,Cpad)
    w_o1 = jnp.concatenate([wt[:, 2], jnp.zeros_like(wt[:, 2])], axis=1)
    wc = jnp.stack([w_o0, w_o1], axis=1).astype(jnp.bfloat16)       # (3,2,2Cin,Cpad)
    bc = jnp.pad(conv_b, (0, c_pad - c_enc)).reshape(1, c_pad).astype(jnp.float32)

    # Constant pooling matrix: pooled row = pm @ row_acc (means baked in).
    pm = (jnp.arange(wo)[None, :] // kw == jnp.arange(s)[:, None])
    pm = pm.astype(jnp.float32) / float(kh * kw)                     # (S, Wo)

    # Classifier head parameters (fp32; tiny).
    wf = jnp.pad(jnp.transpose(fc_w),
                 ((0, c_pad - c_enc), (0, a_pad - n_attrs))).astype(jnp.float32)
    bf = jnp.pad(fc_b, (0, a_pad - n_attrs)).reshape(1, a_pad).astype(jnp.float32)

    cost = pl.CostEstimate(
        flops=2 * b * ho * wo * (9 * c_in) * c_pad + 2 * b * c_pad * a_pad,
        transcendentals=0,
        bytes_accessed=(b * s * (2 * kh + 1) * wq * c2 * 2        # bf16 slabs
                        + 3 * 2 * c2 * c_pad * 2                  # conv weights
                        + c_pad * a_pad * 4 + a_pad * 4 + c_pad * 4
                        + s * wo * 4
                        + b * s * s * c_pad * 4 + b * a_pad * 4)) # outputs

    pooled_p, attrs_p = pl.pallas_call(
        functools.partial(_fused_encoder_kernel, kh=kh, wo=wo,
                          inv_count=1.0 / float(ho * wo)),
        out_shape=(
            jax.ShapeDtypeStruct((b, s, s, c_pad), jnp.float32),
            jax.ShapeDtypeStruct((b, 1, a_pad), jnp.float32),
        ),
        grid=(b, s),
        in_specs=[
            # Main slab: 2*kh padded-input rows for pooled row oy.
            pl.BlockSpec((1, 2 * kh, wq, c2), lambda bb, oy: (bb, oy, 0, 0)),
            # One extra overlap row (row 2*kh*(oy+1)); block size 1 along H,
            # so the block index equals the element row index.
            pl.BlockSpec((1, 1, wq, c2),
                         lambda bb, oy: (bb, 2 * kh * (oy + 1), 0, 0)),
            pl.BlockSpec((3, 2, c2, c_pad), lambda bb, oy: (0, 0, 0, 0)),
            pl.BlockSpec((1, c_pad), lambda bb, oy: (0, 0)),
            pl.BlockSpec((s, wo), lambda bb, oy: (0, 0)),
            pl.BlockSpec((c_pad, a_pad), lambda bb, oy: (0, 0)),
            pl.BlockSpec((1, a_pad), lambda bb, oy: (0, 0)),
        ],
        out_specs=(
            pl.BlockSpec((1, 1, s, c_pad), lambda bb, oy: (bb, oy, 0, 0)),
            pl.BlockSpec((1, 1, a_pad), lambda bb, oy: (bb, 0, 0)),
        ),
        scratch_shapes=[pltpu.VMEM((1, c_pad), jnp.float32)],
        compiler_params=pltpu.CompilerParams(
            # batch axis parallel (shards across v7x's 2 TCs); pooled-row axis
            # MUST stay "arbitrary" (sequential) for the gacc accumulator.
            dimension_semantics=("parallel", "arbitrary"),
            vmem_limit_bytes=_VMEM_LIMIT),
        cost_estimate=cost,
    )(xs, xs, wc, bc, pm, wf, bf)

    encoder_features = pooled_p[:, :, :, :c_enc]          # (B, S, S, C_enc)
    encoder_attrs = attrs_p[:, 0, :n_attrs]               # (B, num_attrs)
    return encoder_features, encoder_attrs


# ----------------------------------------------------------------------------
# Deterministic parameter construction (synthetic backbone weights)
# ----------------------------------------------------------------------------

def make_params(key, c_in=3, c_enc=32, num_attrs=16):
    k1, k2, k3, k4 = jax.random.split(key, 4)
    conv_w = 0.1 * jax.random.normal(k1, (c_enc, c_in, 3, 3), jnp.float32)
    conv_b = 0.1 * jax.random.normal(k2, (c_enc,), jnp.float32)
    fc_w = 0.1 * jax.random.normal(k3, (num_attrs, c_enc), jnp.float32)
    fc_b = 0.1 * jax.random.normal(k4, (num_attrs,), jnp.float32)
    return conv_w, conv_b, fc_w, fc_b


def _reference_forward(images_nchw, params, enc_image_size):
    """Pure-JAX reference of the synthetic backbone forward (for validation)."""
    conv_w, conv_b, fc_w, fc_b = params
    x = jnp.transpose(images_nchw, (0, 2, 3, 1)).astype(jnp.float32)
    w_hwio = jnp.transpose(conv_w, (2, 3, 1, 0))
    feats = jax.lax.conv_general_dilated(
        x, w_hwio, window_strides=(2, 2), padding=((1, 1), (1, 1)),
        dimension_numbers=("NHWC", "HWIO", "NHWC"))
    feats = jnp.maximum(feats + conv_b, 0.0)
    bb, hf, wf, c = feats.shape
    s = enc_image_size
    kh, kw = hf // s, wf // s
    pooled = feats.reshape(bb, s, kh, s, kw, c).mean(axis=(2, 4))
    attrs = feats.mean(axis=(1, 2)) @ fc_w.T + fc_b
    return pooled, attrs


# TODO(synk): the real module delegates to a pretrained EfficientNet backbone
# (many MBConv blocks); a single conv stem + linear head stands in, since
# checkpoint loading is out of scope.

if __name__ == "__main__":
    key = jax.random.PRNGKey(0)
    pkey, xkey = jax.random.split(key)

    # Small shapes: batch=2, 3-channel 16x16 images, encoded_image_size=4,
    # encoder_dim=32, num_attrs=16.
    params = make_params(pkey, c_in=3, c_enc=32, num_attrs=16)
    images = jax.random.normal(xkey, (2, 3, 16, 16), jnp.float32)   # NCHW input

    enc_feats, enc_attrs = encoder_forward(images, params, enc_image_size=4)
    jax.block_until_ready((enc_feats, enc_attrs))

    assert enc_feats.shape == (2, 4, 4, 32), enc_feats.shape
    assert enc_attrs.shape == (2, 16), enc_attrs.shape

    # Numerical sanity check against a pure-JAX fp32 reference (kernel streams
    # bf16 operands with fp32 accumulation, so use a slightly looser bound).
    ref_feats, ref_attrs = _reference_forward(images, params, enc_image_size=4)
    ref_feats, ref_attrs = jax.block_until_ready((ref_feats, ref_attrs))
    assert jnp.allclose(enc_feats, ref_feats, atol=2e-2, rtol=2e-2), (
        float(jnp.max(jnp.abs(enc_feats - ref_feats))))
    assert jnp.allclose(enc_attrs, ref_attrs, atol=2e-2, rtol=2e-2), (
        float(jnp.max(jnp.abs(enc_attrs - ref_attrs))))

    print("KERNEL_OK")
</pallas_src>

<mosaic_0001>
module attributes {stable_mosaic.version = 11 : i64} {
  func.func @_fused_encoder_kernel(%arg0: i32, %arg1: i32, %arg2: memref<1x4x9x6xbf16, #tpu.memory_space<vmem>>, %arg3: memref<1x1x9x6xbf16, #tpu.memory_space<vmem>>, %arg4: memref<3x2x6x128xbf16, #tpu.memory_space<vmem>>, %arg5: memref<1x128xf32, #tpu.memory_space<vmem>>, %arg6: memref<4x8xf32, #tpu.memory_space<vmem>>, %arg7: memref<128x128xf32, #tpu.memory_space<vmem>>, %arg8: memref<1x128xf32, #tpu.memory_space<vmem>>, %arg9: memref<1x1x4x128xf32, #tpu.memory_space<vmem>>, %arg10: memref<1x1x128xf32, #tpu.memory_space<vmem>>, %arg11: memref<1x128xf32, #tpu.memory_space<vmem>>) attributes {dimension_semantics = [#tpu.dimension_semantics<parallel>, #tpu.dimension_semantics<arbitrary>], iteration_bounds = array<i64: 2, 4>, scalar_prefetch = 0 : i64, scratch_operands = 1 : i64, tpu.core_type = #tpu.core_type<tc>, window_params = [{transform_indices = @transform_0, window_bounds = array<i64: 1, 4, 9, 6>}, {transform_indices = @transform_1, window_bounds = array<i64: 1, 1, 9, 6>}, {pipeline_mode = #tpu.pipeline_mode<synchronous>, transform_indices = @transform_2, window_bounds = array<i64: 3, 2, 6, 128>}, {pipeline_mode = #tpu.pipeline_mode<synchronous>, transform_indices = @transform_3, window_bounds = array<i64: 1, 128>}, {pipeline_mode = #tpu.pipeline_mode<synchronous>, transform_indices = @transform_4, window_bounds = array<i64: 4, 8>}, {pipeline_mode = #tpu.pipeline_mode<synchronous>, transform_indices = @transform_5, window_bounds = array<i64: 128, 128>}, {pipeline_mode = #tpu.pipeline_mode<synchronous>, transform_indices = @transform_6, window_bounds = array<i64: 1, 128>}, {transform_indices = @transform_7, window_bounds = array<i64: 1, 1, 4, 128>}, {transform_indices = @transform_8, window_bounds = array<i64: 1, 1, 128>}]} {
    %c0_i32 = arith.constant 0 : i32
    %0 = arith.cmpi eq, %arg1, %c0_i32 : i32
    %1 = arith.extui %0 : i1 to i32
    %c0_i32_0 = arith.constant 0 : i32
    %2 = arith.cmpi ne, %1, %c0_i32_0 : i32
    scf.if %2 {
      %cst_85 = arith.constant 0.000000e+00 : f32
      %102 = vector.broadcast %cst_85 : f32 to vector<1x128xf32>
      %c0_86 = arith.constant 0 : index
      %c0_87 = arith.constant 0 : index
      %103 = vector.load %arg11[%c0_86, %c0_87] : memref<1x128xf32, #tpu.memory_space<vmem>>, vector<1x128xf32>
      tpu.vector_store %arg11[%c0_86, %c0_87], %102 {strides = array<i32>} : memref<1x128xf32, #tpu.memory_space<vmem>>, vector<1x128xf32>,
    } else {
    }
    %c0 = arith.constant 0 : index
    %c0_1 = arith.constant 0 : index
    %c0_2 = arith.constant 0 : index
    %c0_3 = arith.constant 0 : index
    %3 = vector.load %arg2[%c0, %c0_1, %c0_2, %c0_3] : memref<1x4x9x6xbf16, #tpu.memory_space<vmem>>, vector<1x4x9x6xbf16>
    %c0_4 = arith.constant 0 : index
    %c0_5 = arith.constant 0 : index
    %c0_6 = arith.constant 0 : index
    %c0_7 = arith.constant 0 : index
    %4 = vector.load %arg3[%c0_4, %c0_5, %c0_6, %c0_7] : memref<1x1x9x6xbf16, #tpu.memory_space<vmem>>, vector<1x1x9x6xbf16>
    %c0_8 = arith.constant 0 : index
    %c0_9 = arith.constant 0 : index
    %5 = vector.load %arg5[%c0_8, %c0_9] : memref<1x128xf32, #tpu.memory_space<vmem>>, vector<1x128xf32>
    %cst = arith.constant 0.000000e+00 : f32
    %6 = vector.broadcast %cst : f32 to vector<8x128xf32>
    %cst_10 = arith.constant 0.000000e+00 : f32
    %7 = vector.broadcast %cst_10 : f32 to vector<8x128xf32>
    %8 = vector.extract_strided_slice %3 {offsets = [0, 0, 0, 0], sizes = [1, 1, 9, 6], strides = [1, 1, 1, 1]} : vector<1x4x9x6xbf16> to vector<1x1x9x6xbf16>
    %9 = vector.shape_cast %8 : vector<1x1x9x6xbf16> to vector<9x6xbf16>
    %10 = vector.extract_strided_slice %9 {offsets = [0, 0], sizes = [8, 6], strides = [1, 1]} : vector<9x6xbf16> to vector<8x6xbf16>
    %c0_11 = arith.constant 0 : index
    %c0_12 = arith.constant 0 : index
    %c0_13 = arith.constant 0 : index
    %c0_14 = arith.constant 0 : index
    %11 = vector.load %arg4[%c0_11, %c0_12, %c0_13, %c0_14] : memref<3x2x6x128xbf16, #tpu.memory_space<vmem>>, vector<1x1x6x128xbf16>
    %12 = vector.shape_cast %11 : vector<1x1x6x128xbf16> to vector<6x128xbf16>
    %cst_15 = arith.constant dense<0.000000e+00> : vector<8x128xf32>
    %13 = tpu.matmul %10, %12, %cst_15 {dimension_numbers = #tpu.dot_dimension_numbers<[1], [0], [0], [1], [0, 0, 1, 1], [], []>} : vector<8x6xbf16>, vector<6x128xbf16>, vector<8x128xf32> -> vector<8x128xf32>
    %14 = arith.addf %7, %13 : vector<8x128xf32>
    %15 = vector.extract_strided_slice %9 {offsets = [1, 0], sizes = [8, 6], strides = [1, 1]} : vector<9x6xbf16> to vector<8x6xbf16>
    %c0_16 = arith.constant 0 : index
    %c1 = arith.constant 1 : index
    %c0_17 = arith.constant 0 : index
    %c0_18 = arith.constant 0 : index
    %16 = vector.load %arg4[%c0_16, %c1, %c0_17, %c0_18] : memref<3x2x6x128xbf16, #tpu.memory_space<vmem>>, vector<1x1x6x128xbf16>
    %17 = vector.shape_cast %16 : vector<1x1x6x128xbf16> to vector<6x128xbf16>
    %cst_19 = arith.constant dense<0.000000e+00> : vector<8x128xf32>
    %18 = tpu.matmul %15, %17, %cst_19 {dimension_numbers = #tpu.dot_dimension_numbers<[1], [0], [0], [1], [0, 0, 1, 1], [], []>} : vector<8x6xbf16>, vector<6x128xbf16>, vector<8x128xf32> -> vector<8x128xf32>
    %19 = arith.addf %14, %18 : vector<8x128xf32>
    %20 = vector.extract_strided_slice %3 {offsets = [0, 1, 0, 0], sizes = [1, 1, 9, 6], strides = [1, 1, 1, 1]} : vector<1x4x9x6xbf16> to vector<1x1x9x6xbf16>
    %21 = vector.shape_cast %20 : vector<1x1x9x6xbf16> to vector<9x6xbf16>
    %22 = vector.extract_strided_slice %21 {offsets = [0, 0], sizes = [8, 6], strides = [1, 1]} : vector<9x6xbf16> to vector<8x6xbf16>
    %c1_20 = arith.constant 1 : index
    %c0_21 = arith.constant 0 : index
    %c0_22 = arith.constant 0 : index
    %c0_23 = arith.constant 0 : index
    %23 = vector.load %arg4[%c1_20, %c0_21, %c0_22, %c0_23] : memref<3x2x6x128xbf16, #tpu.memory_space<vmem>>, vector<1x1x6x128xbf16>
    %24 = vector.shape_cast %23 : vector<1x1x6x128xbf16> to vector<6x128xbf16>
    %cst_24 = arith.constant dense<0.000000e+00> : vector<8x128xf32>
    %25 = tpu.matmul %22, %24, %cst_24 {dimension_numbers = #tpu.dot_dimension_numbers<[1], [0], [0], [1], [0, 0, 1, 1], [], []>} : vector<8x6xbf16>, vector<6x128xbf16>, vector<8x128xf32> -> vector<8x128xf32>
    %26 = arith.addf %19, %25 : vector<8x128xf32>
    %27 = vector.extract_strided_slice %21 {offsets = [1, 0], sizes = [8, 6], strides = [1, 1]} : vector<9x6xbf16> to vector<8x6xbf16>
    %c1_25 = arith.constant 1 : index
    %c1_26 = arith.constant 1 : index
    %c0_27 = arith.constant 0 : index
    %c0_28 = arith.constant 0 : index
    %28 = vector.load %arg4[%c1_25, %c1_26, %c0_27, %c0_28] : memref<3x2x6x128xbf16, #tpu.memory_space<vmem>>, vector<1x1x6x128xbf16>
    %29 = vector.shape_cast %28 : vector<1x1x6x128xbf16> to vector<6x128xbf16>
    %cst_29 = arith.constant dense<0.000000e+00> : vector<8x128xf32>
    %30 = tpu.matmul %27, %29, %cst_29 {dimension_numbers = #tpu.dot_dimension_numbers<[1], [0], [0], [1], [0, 0, 1, 1], [], []>} : vector<8x6xbf16>, vector<6x128xbf16>, vector<8x128xf32> -> vector<8x128xf32>
    %31 = arith.addf %26, %30 : vector<8x128xf32>
    %32 = vector.extract_strided_slice %3 {offsets = [0, 2, 0, 0], sizes = [1, 1, 9, 6], strides = [1, 1, 1, 1]} : vector<1x4x9x6xbf16> to vector<1x1x9x6xbf16>
    %33 = vector.shape_cast %32 : vector<1x1x9x6xbf16> to vector<9x6xbf16>
    %34 = vector.extract_strided_slice %33 {offsets = [0, 0], sizes = [8, 6], strides = [1, 1]} : vector<9x6xbf16> to vector<8x6xbf16>
    %c2 = arith.constant 2 : index
    %c0_30 = arith.constant 0 : index
    %c0_31 = arith.constant 0 : index
    %c0_32 = arith.constant 0 : index
    %35 = vector.load %arg4[%c2, %c0_30, %c0_31, %c0_32] : memref<3x2x6x128xbf16, #tpu.memory_space<vmem>>, vector<1x1x6x128xbf16>
    %36 = vector.shape_cast %35 : vector<1x1x6x128xbf16> to vector<6x128xbf16>
    %cst_33 = arith.constant dense<0.000000e+00> : vector<8x128xf32>
    %37 = tpu.matmul %34, %36, %cst_33 {dimension_numbers = #tpu.dot_dimension_numbers<[1], [0], [0], [1], [0, 0, 1, 1], [], []>} : vector<8x6xbf16>, vector<6x128xbf16>, vector<8x128xf32> -> vector<8x128xf32>
    %38 = arith.addf %31, %37 : vector<8x128xf32>
    %39 = vector.extract_strided_slice %33 {offsets = [1, 0], sizes = [8, 6], strides = [1, 1]} : vector<9x6xbf16> to vector<8x6xbf16>
    %c2_34 = arith.constant 2 : index
    %c1_35 = arith.constant 1 : index
    %c0_36 = arith.constant 0 : index
    %c0_37 = arith.constant 0 : index
    %40 = vector.load %arg4[%c2_34, %c1_35, %c0_36, %c0_37] : memref<3x2x6x128xbf16, #tpu.memory_space<vmem>>, vector<1x1x6x128xbf16>
    %41 = vector.shape_cast %40 : vector<1x1x6x128xbf16> to vector<6x128xbf16>
    %cst_38 = arith.constant dense<0.000000e+00> : vector<8x128xf32>
    %42 = tpu.matmul %39, %41, %cst_38 {dimension_numbers = #tpu.dot_dimension_numbers<[1], [0], [0], [1], [0, 0, 1, 1], [], []>} : vector<8x6xbf16>, vector<6x128xbf16>, vector<8x128xf32> -> vector<8x128xf32>
    %43 = arith.addf %38, %42 : vector<8x128xf32>
    %44 = vector.broadcast %5 : vector<1x128xf32> to vector<8x128xf32>
    %45 = arith.addf %43, %44 : vector<8x128xf32>
    %cst_39 = arith.constant 0.000000e+00 : f32
    %46 = vector.broadcast %cst_39 : f32 to vector<8x128xf32>
    %47 = arith.maximumf %45, %46 : vector<8x128xf32>
    %48 = arith.addf %6, %47 : vector<8x128xf32>
    %cst_40 = arith.constant 0.000000e+00 : f32
    %49 = vector.broadcast %cst_40 : f32 to vector<8x128xf32>
    %50 = vector.extract_strided_slice %3 {offsets = [0, 2, 0, 0], sizes = [1, 1, 9, 6], strides = [1, 1, 1, 1]} : vector<1x4x9x6xbf16> to vector<1x1x9x6xbf16>
    %51 = vector.shape_cast %50 : vector<1x1x9x6xbf16> to vector<9x6xbf16>
    %52 = vector.extract_strided_slice %51 {offsets = [0, 0], sizes = [8, 6], strides = [1, 1]} : vector<9x6xbf16> to vector<8x6xbf16>
    %c0_41 = arith.constant 0 : index
    %c0_42 = arith.constant 0 : index
    %c0_43 = arith.constant 0 : index
    %c0_44 = arith.constant 0 : index
    %53 = vector.load %arg4[%c0_41, %c0_42, %c0_43, %c0_44] : memref<3x2x6x128xbf16, #tpu.memory_space<vmem>>, vector<1x1x6x128xbf16>
    %54 = vector.shape_cast %53 : vector<1x1x6x128xbf16> to vector<6x128xbf16>
    %cst_45 = arith.constant dense<0.000000e+00> : vector<8x128xf32>
    %55 = tpu.matmul %52, %54, %cst_45 {dimension_numbers = #tpu.dot_dimension_numbers<[1], [0], [0], [1], [0, 0, 1, 1], [], []>} : vector<8x6xbf16>, vector<6x128xbf16>, vector<8x128xf32> -> vector<8x128xf32>
    %56 = arith.addf %49, %55 : vector<8x128xf32>
    %57 = vector.extract_strided_slice %51 {offsets = [1, 0], sizes = [8, 6], strides = [1, 1]} : vector<9x6xbf16> to vector<8x6xbf16>
    %c0_46 = arith.constant 0 : index
    %c1_47 = arith.constant 1 : index
    %c0_48 = arith.constant 0 : index
    %c0_49 = arith.constant 0 : index
    %58 = vector.load %arg4[%c0_46, %c1_47, %c0_48, %c0_49] : memref<3x2x6x128xbf16, #tpu.memory_space<vmem>>, vector<1x1x6x128xbf16>
    %59 = vector.shape_cast %58 : vector<1x1x6x128xbf16> to vector<6x128xbf16>
    %cst_50 = arith.constant dense<0.000000e+00> : vector<8x128xf32>
    %60 = tpu.matmul %57, %59, %cst_50 {dimension_numbers = #tpu.dot_dimension_numbers<[1], [0], [0], [1], [0, 0, 1, 1], [], []>} : vector<8x6xbf16>, vector<6x128xbf16>, vector<8x128xf32> -> vector<8x128xf32>
    %61 = arith.addf %56, %60 : vector<8x128xf32>
    %62 = vector.extract_strided_slice %3 {offsets = [0, 3, 0, 0], sizes = [1, 1, 9, 6], strides = [1, 1, 1, 1]} : vector<1x4x9x6xbf16> to vector<1x1x9x6xbf16>
    %63 = vector.shape_cast %62 : vector<1x1x9x6xbf16> to vector<9x6xbf16>
    %64 = vector.extract_strided_slice %63 {offsets = [0, 0], sizes = [8, 6], strides = [1, 1]} : vector<9x6xbf16> to vector<8x6xbf16>
    %c1_51 = arith.constant 1 : index
    %c0_52 = arith.constant 0 : index
    %c0_53 = arith.constant 0 : index
    %c0_54 = arith.constant 0 : index
    %65 = vector.load %arg4[%c1_51, %c0_52, %c0_53, %c0_54] : memref<3x2x6x128xbf16, #tpu.memory_space<vmem>>, vector<1x1x6x128xbf16>
    %66 = vector.shape_cast %65 : vector<1x1x6x128xbf16> to vector<6x128xbf16>
    %cst_55 = arith.constant dense<0.000000e+00> : vector<8x128xf32>
    %67 = tpu.matmul %64, %66, %cst_55 {dimension_numbers = #tpu.dot_dimension_numbers<[1], [0], [0], [1], [0, 0, 1, 1], [], []>} : vector<8x6xbf16>, vector<6x128xbf16>, vector<8x128xf32> -> vector<8x128xf32>
    %68 = arith.addf %61, %67 : vector<8x128xf32>
    %69 = vector.extract_strided_slice %63 {offsets = [1, 0], sizes = [8, 6], strides = [1, 1]} : vector<9x6xbf16> to vector<8x6xbf16>
    %c1_56 = arith.constant 1 : index
    %c1_57 = arith.constant 1 : index
    %c0_58 = arith.constant 0 : index
    %c0_59 = arith.constant 0 : index
    %70 = vector.load %arg4[%c1_56, %c1_57, %c0_58, %c0_59] : memref<3x2x6x128xbf16, #tpu.memory_space<vmem>>, vector<1x1x6x128xbf16>
    %71 = vector.shape_cast %70 : vector<1x1x6x128xbf16> to vector<6x128xbf16>
    %cst_60 = arith.constant dense<0.000000e+00> : vector<8x128xf32>
    %72 = tpu.matmul %69, %71, %cst_60 {dimension_numbers = #tpu.dot_dimension_numbers<[1], [0], [0], [1], [0, 0, 1, 1], [], []>} : vector<8x6xbf16>, vector<6x128xbf16>, vector<8x128xf32> -> vector<8x128xf32>
    %73 = arith.addf %68, %72 : vector<8x128xf32>
    %74 = vector.shape_cast %4 : vector<1x1x9x6xbf16> to vector<9x6xbf16>
    %75 = vector.extract_strided_slice %74 {offsets = [0, 0], sizes = [8, 6], strides = [1, 1]} : vector<9x6xbf16> to vector<8x6xbf16>
    %c2_61 = arith.constant 2 : index
    %c0_62 = arith.constant 0 : index
    %c0_63 = arith.constant 0 : index
    %c0_64 = arith.constant 0 : index
    %76 = vector.load %arg4[%c2_61, %c0_62, %c0_63, %c0_64] : memref<3x2x6x128xbf16, #tpu.memory_space<vmem>>, vector<1x1x6x128xbf16>
    %77 = vector.shape_cast %76 : vector<1x1x6x128xbf16> to vector<6x128xbf16>
    %cst_65 = arith.constant dense<0.000000e+00> : vector<8x128xf32>
    %78 = tpu.matmul %75, %77, %cst_65 {dimension_numbers = #tpu.dot_dimension_numbers<[1], [0], [0], [1], [0, 0, 1, 1], [], []>} : vector<8x6xbf16>, vector<6x128xbf16>, vector<8x128xf32> -> vector<8x128xf32>
    %79 = arith.addf %73, %78 : vector<8x128xf32>
    %80 = vector.extract_strided_slice %74 {offsets = [1, 0], sizes = [8, 6], strides = [1, 1]} : vector<9x6xbf16> to vector<8x6xbf16>
    %c2_66 = arith.constant 2 : index
    %c1_67 = arith.constant 1 : index
    %c0_68 = arith.constant 0 : index
    %c0_69 = arith.constant 0 : index
    %81 = vector.load %arg4[%c2_66, %c1_67, %c0_68, %c0_69] : memref<3x2x6x128xbf16, #tpu.memory_space<vmem>>, vector<1x1x6x128xbf16>
    %82 = vector.shape_cast %81 : vector<1x1x6x128xbf16> to vector<6x128xbf16>
    %cst_70 = arith.constant dense<0.000000e+00> : vector<8x128xf32>
    %83 = tpu.matmul %80, %82, %cst_70 {dimension_numbers = #tpu.dot_dimension_numbers<[1], [0], [0], [1], [0, 0, 1, 1], [], []>} : vector<8x6xbf16>, vector<6x128xbf16>, vector<8x128xf32> -> vector<8x128xf32>
    %84 = arith.addf %79, %83 : vector<8x128xf32>
    %85 = vector.broadcast %5 : vector<1x128xf32> to vector<8x128xf32>
    %86 = arith.addf %84, %85 : vector<8x128xf32>
    %cst_71 = arith.constant 0.000000e+00 : f32
    %87 = vector.broadcast %cst_71 : f32 to vector<8x128xf32>
    %88 = arith.maximumf %86, %87 : vector<8x128xf32>
    %89 = arith.addf %48, %88 : vector<8x128xf32>
    %c0_72 = arith.constant 0 : index
    %c0_73 = arith.constant 0 : index
    %90 = vector.load %arg6[%c0_72, %c0_73] : memref<4x8xf32, #tpu.memory_space<vmem>>, vector<4x8xf32>
    %cst_74 = arith.constant dense<0.000000e+00> : vector<4x128xf32>
    %91 = tpu.matmul %90, %89, %cst_74 {dimension_numbers = #tpu.dot_dimension_numbers<[1], [0], [0], [1], [0, 0, 1, 1], [], []>} : vector<4x8xf32>, vector<8x128xf32>, vector<4x128xf32> -> vector<4x128xf32>
    %92 = vector.shape_cast %91 : vector<4x128xf32> to vector<1x1x4x128xf32>
    %c0_75 = arith.constant 0 : index
    %c0_76 = arith.constant 0 : index
    %c0_77 = arith.constant 0 : index
    %c0_78 = arith.constant 0 : index
    %93 = vector.load %arg9[%c0_75, %c0_76, %c0_77, %c0_78] : memref<1x1x4x128xf32, #tpu.memory_space<vmem>>, vector<1x1x4x128xf32>
    tpu.vector_store %arg9[%c0_75, %c0_76, %c0_77, %c0_78], %92 {strides = array<i32>} : memref<1x1x4x128xf32, #tpu.memory_space<vmem>>, vector<1x1x4x128xf32>,
    %c0_79 = arith.constant 0 : index
    %c0_80 = arith.constant 0 : index
    %94 = vector.load %arg11[%c0_79, %c0_80] : memref<1x128xf32, #tpu.memory_space<vmem>>, vector<1x128xf32>
    %cst_81 = arith.constant dense<0.000000e+00> : vector<128xf32>
    %95 = vector.multi_reduction <add>, %89, %cst_81 [0] : vector<8x128xf32> to vector<128xf32>
    %96 = vector.shape_cast %95 : vector<128xf32> to vector<1x128xf32>
    %97 = arith.addf %94, %96 : vector<1x128xf32>
    %c0_82 = arith.constant 0 : index
    %c0_83 = arith.constant 0 : index
    %98 = vector.load %arg11[%c0_82, %c0_83] : memref<1x128xf32, #tpu.memory_space<vmem>>, vector<1x128xf32>
    tpu.vector_store %arg11[%c0_82, %c0_83], %97 {strides = array<i32>} : memref<1x128xf32, #tpu.memory_space<vmem>>, vector<1x128xf32>,
    %c3_i32 = arith.constant 3 : i32
    %99 = arith.cmpi eq, %arg1, %c3_i32 : i32
    %100 = arith.extui %99 : i1 to i32
    %c0_i32_84 = arith.constant 0 : i32
    %101 = arith.cmpi ne, %100, %c0_i32_84 : i32
    scf.if %101 {
      %c0_85 = arith.constant 0 : index
      %c0_86 = arith.constant 0 : index
      %102 = vector.load %arg11[%c0_85, %c0_86] : memref<1x128xf32, #tpu.memory_space<vmem>>, vector<1x128xf32>
      %cst_87 = arith.constant 1.562500e-02 : f32
      %103 = vector.broadcast %cst_87 : f32 to vector<1x128xf32>
      %104 = arith.mulf %102, %103 : vector<1x128xf32>
      %c0_88 = arith.constant 0 : index
      %c0_89 = arith.constant 0 : index
      %105 = vector.load %arg7[%c0_88, %c0_89] : memref<128x128xf32, #tpu.memory_space<vmem>>, vector<128x128xf32>
      %cst_90 = arith.constant dense<0.000000e+00> : vector<1x128xf32>
      %106 = tpu.matmul %104, %105, %cst_90 {dimension_numbers = #tpu.dot_dimension_numbers<[1], [0], [0], [1], [0, 0, 1, 1], [], []>} : vector<1x128xf32>, vector<128x128xf32>, vector<1x128xf32> -> vector<1x128xf32>
      %c0_91 = arith.constant 0 : index
      %c0_92 = arith.constant 0 : index
      %107 = vector.load %arg8[%c0_91, %c0_92] : memref<1x128xf32, #tpu.memory_space<vmem>>, vector<1x128xf32>
      %108 = arith.addf %106, %107 : vector<1x128xf32>
      %109 = vector.shape_cast %108 : vector<1x128xf32> to vector<1x1x128xf32>
      %c0_93 = arith.constant 0 : index
      %c0_94 = arith.constant 0 : index
      %c0_95 = arith.constant 0 : index
      %110 = vector.load %arg10[%c0_93, %c0_94, %c0_95] : memref<1x1x128xf32, #tpu.memory_space<vmem>>, vector<1x1x128xf32>
      tpu.vector_store %arg10[%c0_93, %c0_94, %c0_95], %109 {strides = array<i32>} : memref<1x1x128xf32, #tpu.memory_space<vmem>>, vector<1x1x128xf32>,
    } else {
    }
    return
  }
  func.func @transform_0(%arg0: i32, %arg1: i32) -> (i32, i32, i32, i32) {
    %c0_i32 = arith.constant 0 : i32
    %c0_i32_0 = arith.constant 0 : i32
    %c0_i32_1 = arith.constant 0 : i32
    return %arg0, %arg1, %c0_i32, %c0_i32_0 : i32, i32, i32, i32
  }
  func.func @transform_1(%arg0: i32, %arg1: i32) -> (i32, i32, i32, i32) {
    %c1_i32 = arith.constant 1 : i32
    %0 = arith.addi %arg1, %c1_i32 : i32
    %c4_i32 = arith.constant 4 : i32
    %1 = arith.muli %c4_i32, %0 : i32
    %c0_i32 = arith.constant 0 : i32
    %c0_i32_0 = arith.constant 0 : i32
    %c0_i32_1 = arith.constant 0 : i32
    return %arg0, %1, %c0_i32, %c0_i32_0 : i32, i32, i32, i32
  }
  func.func @transform_2(%arg0: i32, %arg1: i32) -> (i32, i32, i32, i32) {
    %c0_i32 = arith.constant 0 : i32
    %c0_i32_0 = arith.constant 0 : i32
    %c0_i32_1 = arith.constant 0 : i32
    %c0_i32_2 = arith.constant 0 : i32
    %c0_i32_3 = arith.constant 0 : i32
    return %c0_i32, %c0_i32_0, %c0_i32_1, %c0_i32_2 : i32, i32, i32, i32
  }
  func.func @transform_3(%arg0: i32, %arg1: i32) -> (i32, i32) {
    %c0_i32 = arith.constant 0 : i32
    %c0_i32_0 = arith.constant 0 : i32
    %c0_i32_1 = arith.constant 0 : i32
    return %c0_i32, %c0_i32_0 : i32, i32
  }
  func.func @transform_4(%arg0: i32, %arg1: i32) -> (i32, i32) {
    %c0_i32 = arith.constant 0 : i32
    %c0_i32_0 = arith.constant 0 : i32
    %c0_i32_1 = arith.constant 0 : i32
    return %c0_i32, %c0_i32_0 : i32, i32
  }
  func.func @transform_5(%arg0: i32, %arg1: i32) -> (i32, i32) {
    %c0_i32 = arith.constant 0 : i32
    %c0_i32_0 = arith.constant 0 : i32
    %c0_i32_1 = arith.constant 0 : i32
    return %c0_i32, %c0_i32_0 : i32, i32
  }
  func.func @transform_6(%arg0: i32, %arg1: i32) -> (i32, i32) {
    %c0_i32 = arith.constant 0 : i32
    %c0_i32_0 = arith.constant 0 : i32
    %c0_i32_1 = arith.constant 0 : i32
    return %c0_i32, %c0_i32_0 : i32, i32
  }
  func.func @transform_7(%arg0: i32, %arg1: i32) -> (i32, i32, i32, i32) {
    %c0_i32 = arith.constant 0 : i32
    %c0_i32_0 = arith.constant 0 : i32
    %c0_i32_1 = arith.constant 0 : i32
    return %arg0, %arg1, %c0_i32, %c0_i32_0 : i32, i32, i32, i32
  }
  func.func @transform_8(%arg0: i32, %arg1: i32) -> (i32, i32, i32) {
    %c0_i32 = arith.constant 0 : i32
    %c0_i32_0 = arith.constant 0 : i32
    %c0_i32_1 = arith.constant 0 : i32
    return %arg0, %c0_i32, %c0_i32_0 : i32, i32, i32
  }
}

</mosaic_0001>

<bundles_post_ra>
// kernel: encoder_forward.1
= control target key start
LH: loop header
LB: loop body
LE: loop exit
PB: predicated region body
PF: predicated region fallthrough
CT: control target
= control target key end

     0   :  { %s2287_s0 = inlined_call_operand.vmem [shape: bf16[2,18,9,6], index: 0, kind: input, shape index: {}, may-alias: {0,1}]   ;;  %s2288_s1 = inlined_call_operand.vmem [shape: bf16[2,18,9,6], index: 1, kind: input, shape index: {}, may-alias: {0,1}]   ;;  %s2289_s2 = inlined_call_operand.vmem [shape: bf16[3,2,6,128], index: 2, kind: input, shape index: {}]   ;;  %s2290_s3 = inlined_call_operand.vmem [shape: f32[1,128], index: 3, kind: input, shape index: {}]   ;;  %s2291_s4 = inlined_call_operand.vmem [shape: f32[4,8], index: 4, kind: input, shape index: {}]   ;;  %s2292_s5 = inlined_call_operand.vmem [shape: f32[128,128], index: 5, kind: input, shape index: {}]   ;;  %s2293_s6 = inlined_call_operand.vmem [shape: f32[1,128], index: 6, kind: input, shape index: {}]   ;;  %s2294_s7 = inlined_call_operand.hbm [shape: f32[2,4,4,128], index: 7, kind: output, shape index: {0}]   ;;  %s2295_s8 = inlined_call_operand.hbm [shape: f32[2,1,128], index: 8, kind: output, shape index: {1}]  }
   0x1   :  { %2312 = sst [smem:[#allocation23_spill]] %s2295_s8 }
   0x2   :  { %14 = vsyncpa [#allocation4], 0 }
   0x3   :  { %16 = vsyncpa [#allocation4 + $0x1], 0 }
   0x4   :  { %17 = vsyncpa [#allocation6], 0 }
   0x5   :  { %19 = vsyncpa [#allocation6 + $0x1], 0  ;;  %s1918_s27 = smov 0   ;;  %s1920_s28 = smov 0  }
   0x6   :  { %s1922_s29 = smov 0   ;;  %s1924_s30 = smov 0  }
   0x7   :  { %s1926_s9 = smov 0   ;;  %s1928_s10 = smov 0  }
   0x8   :  { %s1930_s11 = smov 0   ;;  %s1932_s12 = smov 0  }
   0x9   :  { %s1934_s13 = smov 0   ;;  %s1936_s14 = smov 0  }
   0xa   :  { %s1938_s15 = smov 0  }
   0xb LB: > { %2313 = sst [smem:[#allocation9_spill]] %s1824_s27  ;;  %s1400_s16 = sadd.s32 4294967295, %s1864_s15   ;;  %s1864_s15 = sphi %s1938_s15, %s25_s15   ;;  %s1860_s14 = sphi %s1936_s14, %s2352_s14   ;;  %s1856_s13 = sphi %s1934_s13, %s2351_s13   ;;  %s1852_s12 = sphi %s1932_s12, %s2350_s12   ;;  %s1848_s11 = sphi %s1930_s11, %s2349_s11   ;;  %s1844_s10 = sphi %s1928_s10, %s2348_s10   ;;  %s1840_s9 = sphi %s1926_s9, %s2356_s9   ;;  %s1836_s30 = sphi %s1924_s30, %s2355_s30   ;;  %s1832_s29 = sphi %s1922_s29, %s2346_s29   ;;  %s1828_s28 = sphi %s1920_s28, %s2354_s28   ;;  %s1824_s27 = sphi %s1918_s27, %s2353_s27  }
   0xc   : > { %2314 = sst [smem:[#allocation10_spill]] %s1832_s29  ;;  %s1401_s17 = sadd.s32 4294967294, %s1864_s15  }
   0xd   : > { %2315 = sst [smem:[#allocation11_spill]] %s1836_s30  ;;  %s34_s18 = sadd.s32 1, %s1856_s13 }
   0xe   : > { %2316 = sst [smem:[#allocation12_spill]] %s1844_s10  ;;  %s37_s19 = sadd.s32 1, %s1860_s14 }
   0xf   : > { %2317 = sst [smem:[#allocation13_spill]] %s1856_s13  ;;  %p35_p0 = scmp.ge.s32.totalorder %s34_s18, 4 }
  0x10   : > { %2318 = sst [smem:[#allocation14_spill]] %s1860_s14  ;;  %s211_s20 = sadd.s32 1, %s1844_s10 }
  0x11   : > { %2319 = sst [smem:[#allocation15_spill]] %s1864_s15  ;;  %p221_p1 = scmp.ne.s32.totalorder %s1844_s10, %s1840_s9 }
  0x12   : > { %p1980_p2 = scmp.eq.s32.totalorder %s1400_s16, 7  ;;  %s2358_s18 = smov (%p35_p0, %s34_s18), 0 }
  0x13   : > { %2321 = sst [smem:[#allocation16_spill]] %s2358_s18  ;;  %s2360_s19 = smov (!%p35_p0, %s37_s19), %s1860_s14 }
  0x14   : > { %s207_s22 = ssub.s32 %s1856_s13, %s2358_s18  ;;  %p1991_p3 = por %p1980_p2, %p221_p1 }
  0x15   : > { %p39_p4 = scmp.ge.s32.totalorder %s2360_s19, 2  ;;  %p227_p5 = scmp.ne.s32.totalorder %s1840_s9, %s1836_s30 }
  0x16   : > { %p1997_p6 = scmp.eq.s32.totalorder %s1401_s17, 7  ;;  %s237_s25 = sadd.s32 1, %s1832_s29 }
  0x17   : > { %s2362_s19 = smov (%p39_p4, %s2360_s19), 0  ;;  %p247_p8 = scmp.ne.s32.totalorder %s1832_s29, %s1828_s28 }
  0x18   : > { %2324 = sst [smem:[#allocation17_spill]] %s2362_s19  ;;  %p2006_p7 = por %p1997_p6, %p227_p5 }
  0x19   : > { %s206_s16 = ssub.s32 %s1860_s14, %s2362_s19  ;;  %p253_p9 = scmp.ne.s32.totalorder %s1828_s28, %s1824_s27 }
  0x1a   : > { %s2325_s26 = scalar_select %p2006_p7, 1, 0 }
  0x1b   : > { %s208_s18 = sor.u32 %s207_s22, %s206_s16  ;;  %p235_p10 = scmp.eq.s32.totalorder %s206_s16, 0 }
  0x1c   : > { %2326 = sst [smem:[#allocation18_spill]] %s2325_s26  ;;  %p209_p11 = scmp.eq.s32.totalorder %s208_s18, 0 }
  0x1d   : > { %p2018_p12 = por %p247_p8, %p1980_p2  ;;  %p2030_p13 = por %p253_p9, %p1997_p6 }
  0x1e   : > { %s2023_s13 = scalar_select %p235_p10, %s1832_s29, %s237_s25  }
  0x1f   : > { %s2327_s17 = scalar_select %p2018_p12, 1, 0 }
  0x20   : > { %2329 = sst [smem:[#allocation20_spill]] %s2023_s13  ;;  %p1406_p0 = scmp.ge.s32.totalorder %s1864_s15, 1 }
  0x21   : > { %2328 = sst [smem:[#allocation19_spill]] %s2327_s17  ;;  %p327_p1 = scmp.lt.s32.totalorder %s1864_s15, 9 }
  0x22   : > { %s2026_s30 = scalar_select %p209_p11, %s1844_s10, %s211_s20  }
  0x23   : > { %s2331_s8 = scalar_select %p2030_p13, 1, 0 }
  0x24   : > { %2330 = sst [smem:[#allocation21_spill]] %s2026_s30  ;;  %p328_p4 = pnand %p1406_p0, %p327_p1 }
  0x25   : > { %2332 = sst [smem:[#allocation22_spill]] %s2331_s8  ;;  %s2303_s18 = sand.u32 (!%p328_p4), 1, %s1840_s9  }
  0x26   : > { %331 = sbr.rel (%p328_p4) target bundleno = 784 (0x310), region = 48  ;;  %s2040_s20 = sshll.u32 (!%p328_p4), %s2303_s18, 2 }
  0x27   : > { %s1408_s22 = sshll.u32 (!%p328_p4), %s1848_s11, 2  ;;  %p392_p2 = scmp.lt.s32.totalorder (!%p328_p4), %s1852_s12, 1 }
  0x28   : > { %p394_p5 = scmp.lt.s32.totalorder (!%p328_p4), %s1408_s22, 17  ;;  %s1451_s24 = sadd.s32 (!%p328_p4), 4, %s1408_s22 }
  0x29   : > { %p411_p6 = scmp.lt.s32.totalorder (!%p328_p4), %s1451_s24, 17  ;;  %s379_s17 = scalar_lea.vmem (!%p328_p4), [#allocation3], %s2040_s20 }
  0x2a   : > { %p1414_p8 = scmp.ne.s32.totalorder (!%p328_p4), %s1848_s11, 0 }
  0x2b   : > { %s393_s25 = scalar_select %p392_p2, %s1852_s12, 1 }
  0x2c   : > { %s2364_s22 = smov (!%p394_p5, %s1408_s22), 17  ;;  %s2366_s24 = smov (!%p411_p6, %s1451_s24), 17 }
  0x2d   : > { %s1607_s16 = smul.u32 36, %s393_s25  ;;  %s1409_s19 = sshll.u32 %s2364_s22, 1 }
  0x2e   : > { %s1412_s18 = sshll.u32 %s2366_s24, 1  ;;  %s2333_s25 = sand.u32 1, %s1828_s28  }
  0x2f   : > { %s398_s14 = sadd.s32 %s1607_s16, %s1409_s19  ;;  %s415_s29 = sadd.s32 %s1607_s16, %s1412_s18 }
  0x30   : > { %s1410_s30 = sshll.u32 %s398_s14, 2  ;;  %s1413_s8 = sshll.u32 %s415_s29, 2 }
  0x31   : > { %s2048_s21 = scalar_lea.vmem %s2287_s0, %s1410_s30  ;;  %s2053_s15 = scalar_lea.vmem %s2288_s1, %s1413_s8 }
  0x32   : > { %s2058_s22 = scalar_lea.vmem [#allocation5], %s2333_s25  ;;  %424 = sbr.rel (%p1414_p8) target bundleno = 57 (0x39), region = 52 }
  0x37   : > { %v1866_v0 = vmov 0.0  }
  0x38   : > { %425 = vst [vmem:[#allocation2] sm:$0x1] %v1866_v0 }
  0x39 PF: > { %v437_v1 = vld [vmem:[%s2289_s2] sm:$0x7]  ;;  %vm456_vm0 = vcmask 1042432   ;;  %v1867_v2 = vmov 0.0   ;;  %vm1868_vm1 = vmmov 0   ;;  %vm452_vm2 = vcmask 48128  }
  0x3a   : > { %1501 = vmatprep.subr.bf16.mxu1 %v1867_v2  ;;  %v504_v3 = vsel %vm456_vm0, %v437_v1, 0  ;;  %1503 = vmatprep.mubr.msk.bf16.mxu1 %vm1868_vm1, %v1867_v2  ;;  %v426_v4 = vld [vmem:[%s2048_s21] sm:$0xf]  ;;  %v427_v5 = vld [vmem:[%s2048_s21 + $0x4] sm:$0x1]  ;;  %vm1059_vm3 = vcmask 64512  }
  0x3b   : > { %1502 = vmatpush3.bf16.msra.mxu1 %v504_v3  ;;  %1495 = vmatprep.subr.bf16.mxu0 %v1867_v2  ;;  %v1416_v6 = vcombine.low %v426_v4, %v427_v5  ;;  %v1415_v7 = vld [vmem:[%s2289_s2 + $0x4] sm:$0x7]  ;;  %v1421_v8 = vld [vmem:[%s2289_s2 + $0xc] sm:$0x7]  ;;  %v428_v9 = vld [vmem:[%s2048_s21 + $0x8] sm:$0xf] }
  0x3c   : > { %v458_v10 = vsel %vm456_vm0, %v1415_v7, 0  ;;  %1497 = vmatprep.mubr.msk.bf16.mxu0 %vm1868_vm1, %v1867_v2  ;;  %1513 = vmatprep.subr.bf16.mxu1 %v1867_v2  ;;  %v613_v11 = vsel %vm456_vm0, %v1421_v8, 0  ;;  %v429_v12 = vld [vmem:[%s2048_s21 + $0xc] sm:$0x1]  ;;  %v1419_v16 = vld [vmem:[%s2289_s2 + $0x8] sm:$0x7] }
  0x3d   : > { %v446_v13 = vshrl.u32 %v1416_v6, 16  ;;  %v448_v14 = vshll.u32 %v1416_v6, 16  ;;  %1496 = vmatpush3.bf16.msra.mxu0 %v458_v10  ;;  %v1422_v15 = vcombine.low %v428_v9, %v429_v12  ;;  %v430_v17 = vld [vmem:[%s2048_s21 + $0x10] sm:$0xf]  ;;  %v431_v18 = vld [vmem:[%s2048_s21 + $0x14] sm:$0x1] }
  0x3e   : > { %1504 = vmatmul.mubr.msk.bf16.vlgmr.msra.gmra.mxu1 %vm452_vm2, %v426_v4  ;;  %1507 = vmatprep.subr.bf16.mxu0 %v1867_v2  ;;  %v1427_v22 = vcombine.low %v430_v17, %v431_v18  ;;  %v552_v25 = vsel %vm456_vm0, %v1419_v16, 0  ;;  %v1426_v26 = vld [vmem:[%s2289_s2 + $0x14] sm:$0x7]  ;;  %v1424_v32 = vld [vmem:[%s2289_s2 + $0x10] sm:$0x7]  ;;  %p1439_p9 = scmp.ne.s32.totalorder %s1848_s11, 3 }
  0x3f   : > { %v450_v19 = vrot.slane %v448_v14, 1  ;;  %1514 = vmatpush3.bf16.msra.mxu1 %v613_v11  ;;  %1515 = vmatprep.mubr.msk.bf16.mxu1 %vm1868_vm1, %v1867_v2  ;;  %v603_v20 = vshrl.u32 %v1422_v15, 16  ;;  %v605_v21 = vshll.u32 %v1422_v15, 16  ;;  %v723_v29 = vsel %vm456_vm0, %v1426_v26, 0  ;;  %v432_v35 = vld [vmem:[%s2048_s21 + $0x18] sm:$0xf] }
  0x40   : > { %1525 = vmatprep.subr.bf16.mxu1 %v1867_v2  ;;  %v715_v27 = vshll.u32 %v1427_v22, 16  ;;  %v713_v30 = vshrl.u32 %v1427_v22, 16  ;;  %v662_v33 = vsel %vm456_vm0, %v1424_v32, 0  ;;  %v433_v36 = vld [vmem:[%s2048_s21 + $0x1c] sm:$0x1] }
  0x41   : > { %v451_v23 = vor.u32 %v450_v19, %v446_v13  ;;  %v607_v24 = vrot.slane %v605_v21, 1  ;;  %v1433_v37 = vcombine.low %v432_v35, %v433_v36  ;;  %v434_v39 = vld [vmem:[%s2053_s15] sm:$0xf]  ;;  %v435_v40 = vld [vmem:[%s2053_s15 + $0x4] sm:$0x1] }
  0x42   : > { %v717_v31 = vrot.slane %v715_v27, 1  ;;  %v1436_v43 = vcombine.low %v434_v39, %v435_v40  ;;  %v1429_v36 = vld [vmem:[%s2290_s3] ss:$0 sm:$0xff] }
  0x43   : > { %1498 = vmatmul.mubr.msk.bf16.vlgmr.msra.gmra.mxu0 %vm452_vm2, %v451_v23  ;;  %v608_v28 = vor.u32 %v607_v24, %v603_v20  ;;  %v907_v38 = vshll.u32 %v1433_v37, 16  ;;  %v905_v41 = vshrl.u32 %v1433_v37, 16 }
  0x44   : > { %1508 = vmatpush3.bf16.msra.mxu0 %v552_v25  ;;  %1509 = vmatprep.mubr.msk.bf16.mxu0 %vm1868_vm1, %v1867_v2  ;;  %v718_v34 = vor.u32 %v717_v31, %v713_v30  ;;  %v1007_v45 = vshll.u32 %v1436_v43, 16  ;;  %v1005_v46 = vshrl.u32 %v1436_v43, 16 }
  0x45   : > { %1519 = vmatprep.subr.bf16.mxu0 %v1867_v2  ;;  %v909_v42 = vrot.slane %v907_v38, 1 }
  0x46   : > { %1516 = vmatmul.mubr.msk.bf16.vlgmr.msra.gmra.mxu1 %vm452_vm2, %v608_v28  ;;  %v1009_v47 = vrot.slane %v1007_v45, 1 }
  0x47   : > { %1526 = vmatpush3.bf16.msra.mxu1 %v723_v29  ;;  %1527 = vmatprep.mubr.msk.bf16.mxu1 %vm1868_vm1, %v1867_v2  ;;  %v910_v44 = vor.u32 %v909_v42, %v905_v41 }
  0x48   : > { %1537 = vmatprep.subr.bf16.mxu1 %v1867_v2  ;;  %v1010_v48 = vor.u32 %v1009_v47, %v1005_v46 }
  0x4b   : > { %1510 = vmatmul.mubr.msk.bf16.vlgmr.msra.gmra.mxu0 %vm452_vm2, %v428_v9 }
  0x4c   : > { %1520 = vmatpush3.bf16.msra.mxu0 %v662_v33  ;;  %1521 = vmatprep.mubr.msk.bf16.mxu0 %vm1868_vm1, %v1867_v2 }
  0x4d   : > { %1531 = vmatprep.subr.bf16.mxu0 %v1867_v2 }
  0x4e   : > { %1528 = vmatmul.mubr.msk.bf16.vlgmr.msra.gmra.mxu1 %vm452_vm2, %v718_v34 }
  0x4f   : > { %1538 = vmatpush3.bf16.msra.mxu1 %v504_v3  ;;  %1539 = vmatprep.mubr.msk.bf16.mxu1 %vm1868_vm1, %v1867_v2 }
  0x50   : > { %1549 = vmatprep.subr.bf16.mxu1 %v1867_v2 }
  0x53   : > { %1522 = vmatmul.mubr.msk.bf16.vlgmr.msra.gmra.mxu0 %vm452_vm2, %v430_v17 }
  0x54   : > { %1532 = vmatpush3.bf16.msra.mxu0 %v458_v10  ;;  %1533 = vmatprep.mubr.msk.bf16.mxu0 %vm1868_vm1, %v1867_v2 }
  0x55   : > { %1543 = vmatprep.subr.bf16.mxu0 %v1867_v2 }
  0x56   : > { %1540 = vmatmul.mubr.msk.bf16.vlgmr.msra.gmra.mxu1 %vm452_vm2, %v430_v17 }
  0x57   : > { %1550 = vmatpush3.bf16.msra.mxu1 %v613_v11  ;;  %1551 = vmatprep.mubr.msk.bf16.mxu1 %vm1868_vm1, %v1867_v2 }
  0x58   : > { %1561 = vmatprep.subr.bf16.mxu1 %v1867_v2 }
  0x5b   : > { %1534 = vmatmul.mubr.msk.bf16.vlgmr.msra.gmra.mxu0 %vm452_vm2, %v718_v34 }
  0x5c   : > { %1544 = vmatpush3.bf16.msra.mxu0 %v552_v25  ;;  %1545 = vmatprep.mubr.msk.bf16.mxu0 %vm1868_vm1, %v1867_v2 }
  0x5d   : > { %1555 = vmatprep.subr.bf16.mxu0 %v1867_v2 }
  0x5e   : > { %1552 = vmatmul.mubr.msk.bf16.vlgmr.msra.gmra.mxu1 %vm452_vm2, %v910_v44 }
  0x5f   : > { %1562 = vmatpush3.bf16.msra.mxu1 %v723_v29  ;;  %1563 = vmatprep.mubr.msk.bf16.mxu1 %vm1868_vm1, %v1867_v2 }
  0x63   : > { %1546 = vmatmul.mubr.msk.bf16.vlgmr.msra.gmra.mxu0 %vm452_vm2, %v432_v35 }
  0x64   : > { %1556 = vmatpush3.bf16.msra.mxu0 %v662_v33  ;;  %1557 = vmatprep.mubr.msk.bf16.mxu0 %vm1868_vm1, %v1867_v2 }
  0x65   : > { %1567 = vmatprep.subr.mxu0 %v1867_v2 }
  0x66   : > { %1564 = vmatmul.mubr.msk.bf16.vlgmr.msra.gmra.mxu1 %vm452_vm2, %v1010_v48 }
  0x6b   : > { %1558 = vmatmul.mubr.msk.bf16.vlgmr.msra.gmra.mxu0 %vm452_vm2, %v434_v39 }
  0x6c   : > { %1569 = vmatprep.mubr.msk.f32.mxu0 %vm1868_vm1, %v1867_v2 }
  0xfe   : > { %v540_v49 = vpop.f32.mrf.mxu1 }
 0x100   : > { %v1505_v50 = vpop.f32.mrf.mxu1 }
 0x102   : > { %v543_v51 = vpop.f32.mrf.mxu1 }
 0x103   : > { %v494_v52 = vpop.f32.mrf.mxu0 }
 0x104   : > { %v1506_v53 = vpop.f32.mrf.mxu1  ;;  %v541_v15 = vadd.f32 %v540_v49, %v494_v52  ;;  %v1058_v49 = vld [vmem:[%s2291_s4] sm:$0xf] }
 0x105   : > { %v1499_v54 = vpop.f32.mrf.mxu0 }
 0x106   : > { %v649_v55 = vpop.f32.mrf.mxu1 }
 0x107   : > { %v497_v56 = vpop.f32.mrf.mxu0 }
 0x108   : > { %v1517_v57 = vpop.f32.mrf.mxu1 }
 0x109   : > { %v1500_v58 = vpop.f32.mrf.mxu0 }
 0x10a   : > { %v652_v59 = vpop.f32.mrf.mxu1 }
 0x10b   : > { %v588_v60 = vpop.f32.mrf.mxu0 }
 0x10c   : > { %v1518_v61 = vpop.f32.mrf.mxu1  ;;  %v594_v18 = vadd.f32 %v588_v60, %v541_v15 }
 0x10d   : > { %v1511_v62 = vpop.f32.mrf.mxu0 }
 0x10e   : > { %v759_v63 = vpop.f32.mrf.mxu1  ;;  %v655_v23 = vadd.f32 %v649_v55, %v594_v18  ;;  %v1134_v55 = vld [vmem:[#allocation2] sm:$0x1] }
 0x10f   : > { %v591_v0 = vpop.f32.mrf.mxu0 }
 0x110   : > { %v1529_v1 = vpop.f32.mrf.mxu1 }
 0x111   : > { %v1512_v3 = vpop.f32.mrf.mxu0 }
 0x112   : > { %v762_v4 = vpop.f32.mrf.mxu1 }
 0x113   : > { %v698_v2 = vpop.f32.mrf.mxu0 }
 0x114   : > { %v1530_v5 = vpop.f32.mrf.mxu1  ;;  %v704_v27 = vadd.f32 %v698_v2, %v655_v23 }
 0x115   : > { %v1523_v6 = vpop.f32.mrf.mxu0 }
 0x116   : > { %v849_v7 = vpop.f32.mrf.mxu1  ;;  %v765_v33 = vadd.f32 %v759_v63, %v704_v27 }
 0x117   : > { %v701_v8 = vpop.f32.mrf.mxu0 }
 0x118   : > { %v1541_v9 = vpop.f32.mrf.mxu1  ;;  %v772_v41 = vadd.f32 %v1429_v36, %v765_v33 }
 0x119   : > { %v1524_v10 = vpop.f32.mrf.mxu0 }
 0x11a   : > { %v852_v11 = vpop.f32.mrf.mxu1  ;;  %v773_v46 = vmax.f32 %v772_v41, 0.0 }
 0x11b   : > { %v809_v12 = vpop.f32.mrf.mxu0 }
 0x11c   : > { %v1542_v13 = vpop.f32.mrf.mxu1  ;;  %v850_v24 = vadd.f32 %v849_v7, %v809_v12 }
 0x11d   : > { %v1535_v14 = vpop.f32.mrf.mxu0 }
 0x11e   : > { %v948_v16 = vpop.f32.mrf.mxu1 }
 0x11f   : > { %v812_v17 = vpop.f32.mrf.mxu0 }
 0x120   : > { %v1553_v19 = vpop.f32.mrf.mxu1 }
 0x121   : > { %v1536_v20 = vpop.f32.mrf.mxu0 }
 0x122   : > { %v951_v21 = vpop.f32.mrf.mxu1 }
 0x123   : > { %v892_v22 = vpop.f32.mrf.mxu0 }
 0x124   : > { %v1554_v25 = vpop.f32.mrf.mxu1  ;;  %v898_v28 = vadd.f32 %v892_v22, %v850_v24 }
 0x125   : > { %v1547_v26 = vpop.f32.mrf.mxu0 }
 0x126   : > { %v1048_v29 = vpop.f32.mrf.mxu1  ;;  %v954_v34 = vadd.f32 %v948_v16, %v898_v28 }
 0x127   : > { %v895_v30 = vpop.f32.mrf.mxu0 }
 0x128   : > { %v1565_v31 = vpop.f32.mrf.mxu1 }
 0x129   : > { %v1548_v32 = vpop.f32.mrf.mxu0 }
 0x12a   : > { %v1051_v35 = vpop.f32.mrf.mxu1 }
 0x12b   : > { %v992_v37 = vpop.f32.mrf.mxu0 }
 0x12c   : > { %v998_v38 = vadd.f32 %v992_v37, %v954_v34  ;;  %v1566_v39 = vpop.f32.mrf.mxu1 }
 0x12d   : > { %v1559_v40 = vpop.f32.mrf.mxu0 }
 0x12e   : > { %v1054_v42 = vadd.f32 %v1048_v29, %v998_v38 }
 0x12f   : > { %v995_v43 = vpop.f32.mrf.mxu0 }
 0x130   : > { %v1055_v44 = vadd.f32 %v1429_v36, %v1054_v42 }
 0x131   : > { %v1560_v45 = vpop.f32.mrf.mxu0 }
 0x132   : > { %v1056_v47 = vmax.f32 %v1055_v44, 0.0 }
 0x134   : > { %v1057_v48 = vadd.f32 %v1056_v47, %v773_v46 }
 0x136   : > { %v1135_v50 = vrot.slane %v1057_v48, 4  ;;  %1568 = vmatpush3.msra.mxu0 %v1057_v48 }
 0x137   : > { %1570 = vmatmul.mubr.msk.f32.vlgmr.msra.gmra.mxu0 %vm1059_vm3, %v1058_v49 }
 0x138   : > { %v1136_v51 = vadd.f32 %v1135_v50, %v1057_v48 }
 0x13a   : > { %v1137_v52 = vrot.slane %v1136_v51, 2 }
 0x13c   : > { %v1138_v53 = vadd.f32 %v1137_v52, %v1136_v51 }
 0x13e   : > { %v1139_v54 = vrot.slane %v1138_v53, 1 }
 0x140   : > { %v1140_v56 = vadd.f32 %v1139_v54, %v1138_v53 }
 0x142   : > { %v1141_v57 = vadd.f32 %v1140_v56, %v1134_v55 }
 0x144   : > { %1142 = vst [vmem:[#allocation2] sm:$0x1] %v1141_v57 }
 0x1f5   : > { %1146 = sbr.rel (%p1439_p9) target bundleno = 735 (0x2df), region = 56 }
 0x1f7   : > { %v1129_v58 = vpop.f32.mrf.mxu0 }
 0x1f8   : > { %1133 = vst [vmem:[%s379_s17] sm:$0xf] %v1129_v58 }
 0x1f9   : > { %v1571_v59 = vpop.f32.mrf.mxu0 }
 0x1fa   : > { %v1164_v60 = vld [vmem:[%s2292_s5 + $0x78] sm:$0xff]  ;;  %v1869_v61 = vmov 0.0   ;;  %v1163_v62 = vld [vmem:[%s2292_s5 + $0x70] sm:$0xff]  ;;  %vm1870_vm4 = vmmov 0   ;;  %v1162_v63 = vld [vmem:[%s2292_s5 + $0x68] sm:$0xff] }
 0x1fb   : > { %1572 = vmatprep.subr.mxu0 %v1869_v61  ;;  %1604 = vmatprep.mubr.msk.f32.mxu0 %vm1870_vm4, %v1869_v61  ;;  %v1161_v0 = vld [vmem:[%s2292_s5 + $0x60] sm:$0xff]  ;;  %v1160_v1 = vld [vmem:[%s2292_s5 + $0x58] sm:$0xff]  ;;  %v1159_v3 = vld [vmem:[%s2292_s5 + $0x50] sm:$0xff] }
 0x1fc   : > { %1573 = vmatpush3.msra.mxu0 %v1164_v60  ;;  %v1158_v4 = vld [vmem:[%s2292_s5 + $0x48] sm:$0xff]  ;;  %v1157_v2 = vld [vmem:[%s2292_s5 + $0x40] sm:$0xff]  ;;  %v1156_v5 = vld [vmem:[%s2292_s5 + $0x38] sm:$0xff] }
 0x1fd   : > { %1574 = vmatprep.subr.mxu0 %v1869_v61  ;;  %v1155_v6 = vld [vmem:[%s2292_s5 + $0x30] sm:$0xff]  ;;  %v1154_v7 = vld [vmem:[%s2292_s5 + $0x28] sm:$0xff]  ;;  %v1153_v8 = vld [vmem:[%s2292_s5 + $0x20] sm:$0xff] }
 0x1fe   : > { %1575 = vmatpush3.msra.mxu0 %v1163_v62  ;;  %v1152_v9 = vld [vmem:[%s2292_s5 + $0x18] sm:$0xff]  ;;  %v1151_v10 = vld [vmem:[%s2292_s5 + $0x10] sm:$0xff]  ;;  %v1147_v11 = vld [vmem:[#allocation2] sm:$0x1] }
 0x1ff   : > { %1576 = vmatprep.subr.mxu0 %v1869_v61  ;;  %v1150_v12 = vld [vmem:[%s2292_s5 + $0x8] sm:$0xff]  ;;  %v1149_v13 = vld [vmem:[%s2292_s5] sm:$0xff]  ;;  %v1148_v14 = vmul.f32 0.015625, %v1147_v11 }
 0x200   : > { %1577 = vmatpush3.msra.mxu0 %v1162_v63  ;;  %v1165_v15 = vld [vmem:[%s2293_s6] sm:$0x1] }
 0x201   : > { %1578 = vmatprep.subr.mxu0 %v1869_v61 }
 0x202   : > { %1579 = vmatpush3.msra.mxu0 %v1161_v0 }
 0x203   : > { %1580 = vmatprep.subr.mxu0 %v1869_v61 }
 0x204   : > { %1581 = vmatpush3.msra.mxu0 %v1160_v1 }
 0x205   : > { %1582 = vmatprep.subr.mxu0 %v1869_v61 }
 0x206   : > { %1583 = vmatpush3.msra.mxu0 %v1159_v3 }
 0x207   : > { %1584 = vmatprep.subr.mxu0 %v1869_v61 }
 0x208   : > { %1585 = vmatpush3.msra.mxu0 %v1158_v4 }
 0x209   : > { %1586 = vmatprep.subr.mxu0 %v1869_v61 }
 0x20a   : > { %1587 = vmatpush3.msra.mxu0 %v1157_v2 }
 0x20b   : > { %1588 = vmatprep.subr.mxu0 %v1869_v61 }
 0x20c   : > { %1589 = vmatpush3.msra.mxu0 %v1156_v5 }
 0x20d   : > { %1590 = vmatprep.subr.mxu0 %v1869_v61 }
 0x20e   : > { %1591 = vmatpush3.msra.mxu0 %v1155_v6 }
 0x20f   : > { %1592 = vmatprep.subr.mxu0 %v1869_v61 }
 0x210   : > { %1593 = vmatpush3.msra.mxu0 %v1154_v7 }
 0x211   : > { %1594 = vmatprep.subr.mxu0 %v1869_v61 }
 0x212   : > { %1595 = vmatpush3.msra.mxu0 %v1153_v8 }
 0x213   : > { %1596 = vmatprep.subr.mxu0 %v1869_v61 }
 0x214   : > { %1597 = vmatpush3.msra.mxu0 %v1152_v9 }
 0x215   : > { %1598 = vmatprep.subr.mxu0 %v1869_v61 }
 0x216   : > { %1599 = vmatpush3.msra.mxu0 %v1151_v10 }
 0x217   : > { %1600 = vmatprep.subr.mxu0 %v1869_v61 }
 0x218   : > { %1601 = vmatpush3.msra.mxu0 %v1150_v12 }
 0x219   : > { %1602 = vmatprep.subr.mxu0 %v1869_v61 }
 0x21a   : > { %1603 = vmatpush3.msra.mxu0 %v1149_v13 }
 0x21b   : > { %1605 = vmatmul.mubr.f32.vlgmr.msra.gmra.mxu0 %v1148_v14 }
 0x2db   : > { %v1232_v16 = vpop.f32.mrf.mxu0 }
 0x2dc   : > { %v1233_v17 = vadd.f32 %v1232_v16, %v1165_v15 }
 0x2dd   : > { %v1606_v18 = vpop.f32.mrf.mxu0 }
 0x2de   : > { %1236 = vst [vmem:[%s2058_s22] sm:$0x1] %v1233_v17 }
 0x2df PF: > { %s1441_s13 = sshll.u32 %s1852_s12, 2  ;;  %s1257_s19 = sshll.u32 %s379_s17, 4  ;;  %s1258_s19 = int_to_ptr.vmem [resolvable:$true] %s1257_s19 }
 0x2e0   : > { %s1253_s14 = sadd.s32 %s1848_s11, %s1441_s13  ;;  %s2334_s15 = sand.u32 1, %s1840_s9  }
 0x2e1   : > { %s1442_s26 = sshll.u32 %s1253_s14, 6  ;;  %s1238_s21 = scalar_lea.sflag [#allocation4], %s2334_s15 }
 0x2e2   : > { %s1255_s16 = scalar_lea.hbm %s2294_s7, %s1442_s26  ;;  %s1718_s25 = scalar_lea.vmem %s1258_s19, 64 }
 0x2e3   : > { %p1719_p10 = scmp.ne.s32.totalorder %s1258_s19, %s1718_s25  ;;  %s1871_s30 = smov [#allocation3]  }
 0x2e4   : > { %s1722_s10 = sshll.u32 %s1871_s30, 4  ;;  %s1723_s10 = int_to_ptr.vmem [resolvable:$false] %s1722_s10 }
 0x2e5   : > { %p1720_p11 = pnand %p1719_p10, %p1991_p3  ;;  %s1724_s8 = scalar_lea.vmem %s1723_s10, 128 }
 0x2e6   : > { %p1725_p1 = scmp.lt.s32.totalorder %s1258_s19, %s1723_s10  ;;  %p1726_p4 = scmp.lt.s32.totalorder %s1724_s8, %s1718_s25 }
 0x2e7   : > { %p1721_p0 = pneg %p1720_p11 }
 0x2e8   : > { %p1727_p2 = por %p1726_p4, %p1725_p1 }
 0x2ea   : > { %p1728_p5 = pnand %p1727_p2, %p1721_p0 }
 0x2ec   : > { %1731 = shalt.err (!%p1728_p5)
}
 0x2ed   : > { %s1732_s11 = scalar_lea.hbm %s1255_s16, 64  ;;  %s1736_s27 = scalar_lea.hbm %s2294_s7, 512 }
 0x2ee   : > { %p1733_p6 = scmp.ne.s32.totalorder %s1255_s16, %s1732_s11  ;;  %p1737_p10 = scmp.lt.s32.totalorder %s1255_s16, %s2294_s7 }
 0x2ef   : > { %p1738_p11 = scmp.lt.s32.totalorder %s1736_s27, %s1732_s11 }
 0x2f0   : > { %p1734_p8 = pnand %p1733_p6, %p1991_p3 }
 0x2f1   : > { %p1739_p13 = por %p1738_p11, %p1737_p10 }
 0x2f2   : > { %p1735_p9 = pneg %p1734_p8 }
 0x2f4   : > { %p1740_p7 = pnand %p1739_p13, %p1735_p9 }
 0x2f6   : > { %1743 = shalt.err (!%p1740_p7)
}
 0x2f7   : > { %1608 = dma.vmem_to_hbm [thread:$0]  (%p1991_p3), %s1258_s19, 64, %s1255_s16, %s1238_s21  }
 0x2f8   : > { %s1443_s26 = sshll.u32 %s1852_s12, 4  ;;  %s1270_s18 = sshll.u32 %s2058_s22, 4  ;;  %s1271_s18 = int_to_ptr.vmem [resolvable:$true] %s1270_s18 }
 0x2f9   : > { %s2336_s25 = sld [smem:[#allocation23_spill]]  ;;  %s2337_s10 = sand.u32 1, %s1828_s28  }
 0x2fa   : > { %s1243_s8 = scalar_lea.sflag [#allocation6], %s2337_s10  ;;  %s1744_s11 = scalar_lea.vmem %s1271_s18, 16 }
 0x2fb   : > { %p1745_p0 = scmp.ne.s32.totalorder %s1271_s18, %s1744_s11  ;;  %s1872_s23 = smov [#allocation5]  }
 0x2fc   : > { %s1748_s17 = sshll.u32 %s1872_s23, 4  ;;  %s1749_s17 = int_to_ptr.vmem [resolvable:$false] %s1748_s17 }
 0x2fd   : > { %p1746_p7 = pnand %p1745_p0, %p2018_p12  ;;  %s1750_s20 = scalar_lea.vmem %s1749_s17, 32 }
 0x2fe   : > { %p1751_p1 = scmp.lt.s32.totalorder %s1271_s18, %s1749_s17  ;;  %p1752_p3 = scmp.lt.s32.totalorder %s1750_s20, %s1744_s11 }
 0x2ff   : > { %s1268_s30 = scalar_lea.hbm %s2336_s25, %s1443_s26  ;;  %p1747_p13 = pneg %p1746_p7 }
 0x300   : > { %p1753_p4 = por %p1752_p3, %p1751_p1 }
 0x302   : > { %p1754_p2 = pnand %p1753_p4, %p1747_p13 }
 0x304   : > { %1757 = shalt.err (!%p1754_p2)
}
 0x305   : > { %s1758_s12 = scalar_lea.hbm %s1268_s30, 16  ;;  %s1762_s16 = scalar_lea.hbm %s2336_s25, 32 }
 0x306   : > { %p1759_p5 = scmp.ne.s32.totalorder %s1268_s30, %s1758_s12  ;;  %p1763_p9 = scmp.lt.s32.totalorder %s1268_s30, %s2336_s25 }
 0x307   : > { %p1764_p10 = scmp.lt.s32.totalorder %s1762_s16, %s1758_s12 }
 0x308   : > { %p1760_p6 = pnand %p1759_p5, %p2018_p12 }
 0x309   : > { %p1765_p11 = por %p1764_p10, %p1763_p9 }
 0x30a   : > { %p1761_p8 = pneg %p1760_p6 }
 0x30c   : > { %p1766_p0 = pnand %p1765_p11, %p1761_p8 }
 0x30e   : > { %1769 = shalt.err (!%p1766_p0)
}
 0x30f   : > { %1609 = dma.vmem_to_hbm [thread:$0]  (%p2018_p12), %s1271_s18, 16, %s1268_s30, %s1243_s8  }
 0x310 PF: > { %s2338_s29 = sld [smem:[#allocation15_spill]] }
 0x311   : > { %s2339_s13 = sld [smem:[#allocation11_spill]] }
 0x312   : > { %s2340_s26 = sld [smem:[#allocation18_spill]] }
 0x316   : > { %p1619_p7 = scmp.ge.s32.totalorder %s2338_s29, 2 }
 0x317   : > { %s1282_s24 = sand.u32 1, %s2339_s13  }
 0x318   : > { %p2341_p13 = scmp.ne.s32.totalorder %s2340_s26, 0  ;;  %s1283_s15 = scalar_lea.sflag [#allocation4], %s1282_s24 }
 0x31a   : > { %p1613_p1 = pnand %p1619_p7, %p2341_p13 }
 0x31c   : > { %p1614_p3 = pneg %p1613_p1 }
 0x31e   : > { %1815 = dma.done.wait (%p1614_p3), %s1283_s15, 64  }
 0x31f   : > { %1817 = vsyncadd (%p1614_p3), %s1283_s15, 4294967232  ;;  %s2342_s10 = sld [smem:[#allocation9_spill]] }
 0x320   : > { %s2343_s11 = sld [smem:[#allocation22_spill]] }
 0x325   : > { %s1291_s23 = sand.u32 1, %s2342_s10  }
 0x326   : > { %p2344_p4 = scmp.ne.s32.totalorder %s2343_s11, 0  ;;  %s1292_s14 = scalar_lea.sflag [#allocation6], %s1291_s23 }
 0x328   : > { %p1616_p2 = pnand %p1619_p7, %p2344_p4 }
 0x32a   : > { %p1617_p5 = pneg %p1616_p2 }
 0x32c   : > { %1819 = dma.done.wait (%p1617_p5), %s1292_s14, 16  }
 0x32d   : > { %1821 = vsyncadd (%p1617_p5), %s1292_s14, 4294967280  ;;  %s25_s15 = sadd.s32 1, %s2338_s29   ;;  %s2345_s18 = sld [smem:[#allocation10_spill]] }
 0x32e   : > { %p22_p12 = scmp.ge.s32.totalorder %s25_s15, 10   ;;  %s2346_s29 = sld [smem:[#allocation20_spill]] }
 0x32f   : > { %s2347_s8 = sld [smem:[#allocation12_spill]]  ;;  %s2353_s27 = smov %s1828_s28 }
 0x330   : > { %s2348_s10 = sld [smem:[#allocation21_spill]]  ;;  %s2355_s30 = smov %s1840_s9 }
 0x331   : > { %s2349_s11 = sld [smem:[#allocation13_spill]]  ;;  %24 = sbr.rel (!%p22_p12) target bundleno = 11 (0xb), region = 116 }
 0x332   : > { %s2350_s12 = sld [smem:[#allocation14_spill]] }
 0x333   : > { %s2351_s13 = sld [smem:[#allocation16_spill]]  ;;  %s2354_s28 = smov %s2345_s18 }
 0x334   : > { %s2352_s14 = sld [smem:[#allocation17_spill]] }
 0x335   : > { %s2356_s9 = smov %s2347_s8 }
 0x336   :  { %1296 = vsyncpa [#allocation4], 1 }
 0x337   :  { %1298 = vsyncpa [#allocation4 + $0x1], 1 }
 0x338   :  { %1299 = vsyncpa [#allocation6], 1 }
 0x339   :  { %1301 = vsyncpa [#allocation6 + $0x1], 1 }

</bundles_post_ra>
